<compile_context>
chip_gen: v7x
topology: tpu7x:2x2x1
jax: 0.10.0
libtpu: 0.0.40
codegen_flags: <defaults>
</compile_context>

<pallas_src>
import math
import jax
import jax.numpy as jnp
from jax.experimental import pallas as pl
from jax.experimental.pallas import tpu as pltpu


# ---------------- Pallas kernel ------------------------------------------------------
def pe_add_kernel(x_ref, pe_ref, out_ref):
    # x_ref / out_ref: (TR, TC) tile of one batch element (batch dim squeezed out);
    # pe_ref: matching (TR, TC) tile of the positional-encoding table.
    out_ref[...] = x_ref[...] + pe_ref[...]


# ---------------- setup (mirrors PositionalEncoding_sincos.__init__) -----------------
def make_pe_table(d_model, max_seq_length, dtype=jnp.float32):
    """pe[:, 0::2] = sin(pos * div_term); pe[:, 1::2] = cos(pos * div_term)."""
    position = jnp.arange(max_seq_length, dtype=jnp.float32)[:, None]          # (L, 1)
    div_term = jnp.exp(jnp.arange(0, d_model, 2, dtype=jnp.float32)
                       * -(math.log(10000.0) / d_model))                        # (ceil(D/2),)
    ang = position * div_term                                                   # (L, ceil(D/2))
    pe = jnp.zeros((max_seq_length, d_model), jnp.float32)
    pe = pe.at[:, 0::2].set(jnp.sin(ang))
    pe = pe.at[:, 1::2].set(jnp.cos(ang[:, : d_model // 2]))   # guard odd d_model
    return pe.astype(dtype)


# ---------------- tiling plan ---------------------------------------------------------
def _largest_divisor(n, cap, multiple_of):
    """Largest d with d % multiple_of == 0, d | n, d <= cap.  None if no such d."""
    best = None
    d = multiple_of
    limit = min(n, cap)
    while d <= limit:
        if n % d == 0:
            best = d
        d += multiple_of
    return best


def _plan(S, D, itemsize, target_block_bytes=1 << 20):
    """Choose a contiguous per-batch 2-D view (R, C) of the (S, D) slab plus tile
    sizes (TR, TC) so that lanes are a multiple of 128 and sublane rows a multiple
    of the packing factor whenever the shapes allow it."""
    row_align = max(8, 32 // itemsize)          # f32: 8, bf16: 16, int8: 32

    # 1. lane-dense per-batch view (contiguous reshape, zero data movement).
    if D % 128 == 0:
        R, C = S, D
    else:
        fold = next((f for f in range(1, S + 1)
                     if S % f == 0 and (f * D) % 128 == 0), None)
        if fold is not None:
            R, C = S // fold, fold * D          # fold sequence steps into lanes
        else:
            R, C = S, D                         # fallback: full-dim blocks (correct)

    # 2. column (lane) tile: multiple of 128 dividing C, capped so an 8-row block
    #    stays within the target block size; else full C.
    col_cap = max(128, (target_block_bytes // itemsize) // row_align)
    TC = _largest_divisor(C, col_cap, 128) or C

    # 3. row (sublane) tile: multiple of the packing factor dividing R, sized toward
    #    the ~1 MiB block target; else full R.
    row_cap = max(row_align, target_block_bytes // (TC * itemsize))
    TR = _largest_divisor(R, row_cap, row_align) or R
    return R, C, TR, TC


# ---------------- wrapper (the forward pass) ------------------------------------------
def positional_encoding_sincos(x, pe):
    """forward(x) = x + pe[:x.shape[1]]  (broadcast over batch).  x: (B, S, D)."""
    B, S, D = x.shape
    L, Dp = pe.shape
    if Dp != D:
        raise ValueError(f"d_model mismatch: x has {D}, pe has {Dp}")
    if S > L:
        raise ValueError(f"sequence length {S} exceeds max_seq_length {L}")

    itemsize = jnp.dtype(x.dtype).itemsize
    R, C, TR, TC = _plan(S, D, itemsize)

    x3 = x.reshape(B, R, C)                                   # contiguous view
    pe2 = pe[:S].astype(x.dtype).reshape(R, C)                # add in activation dtype

    grid = (C // TC, R // TR, B)                              # batch innermost
    block_bytes = TR * TC * itemsize
    # double-buffered x + pe + out blocks, with 2x headroom; clamp to sane range.
    vmem_limit = int(min(max(12 * block_bytes, 16 << 20), 64 << 20))

    out = pl.pallas_call(
        pe_add_kernel,
        out_shape=jax.ShapeDtypeStruct((B, R, C), x.dtype),
        grid=grid,
        in_specs=[
            # x: batch dim squeezed; distinct block per (b, ri, cj).
            pl.BlockSpec((None, TR, TC), lambda cj, ri, b: (b, ri, cj)),
            # pe: block index independent of b -> DMA elided on consecutive steps.
            pl.BlockSpec((TR, TC), lambda cj, ri, b: (ri, cj)),
        ],
        out_specs=pl.BlockSpec((None, TR, TC), lambda cj, ri, b: (b, ri, cj)),
        compiler_params=pltpu.CompilerParams(
            # Outer tile axes parallel (v7x megacore sharding); innermost batch axis
            # kept sequential so the constant PE block index reuses its VMEM copy.
            dimension_semantics=("parallel", "parallel", "arbitrary"),
            vmem_limit_bytes=vmem_limit,
        ),
    )(x3, pe2)
    return out.reshape(B, S, D)


# ---------------- main -----------------------------------------------------------------
if __name__ == "__main__":
    key = jax.random.PRNGKey(0)

    # Case 1: module-sized demo (small d_model -> lane folding path).
    B, S, D, MAX_SEQ = 2, 8, 32, 16
    x = jax.random.normal(key, (B, S, D), dtype=jnp.float32)
    pe = make_pe_table(D, MAX_SEQ)
    out = jax.block_until_ready(jax.jit(positional_encoding_sincos)(x, pe))
    ref = x + pe[None, :S, :]
    assert out.shape == (B, S, D)
    assert jnp.allclose(out, ref, rtol=1e-6, atol=1e-6), "mismatch (case 1)"

    # Case 2: lane-dense d_model (D % 128 == 0 path, row-tiled).
    B2, S2, D2, MAX2 = 2, 16, 128, 32
    x2 = jax.random.normal(jax.random.PRNGKey(1), (B2, S2, D2), dtype=jnp.float32)
    pe2 = make_pe_table(D2, MAX2)
    out2 = jax.block_until_ready(jax.jit(positional_encoding_sincos)(x2, pe2))
    ref2 = x2 + pe2[None, :S2, :]
    assert out2.shape == (B2, S2, D2)
    assert jnp.allclose(out2, ref2, rtol=1e-6, atol=1e-6), "mismatch (case 2)"

    print("KERNEL_OK")
</pallas_src>

<mosaic_0001>
module attributes {stable_mosaic.version = 11 : i64} {
  func.func @pe_add_kernel(%arg0: i32, %arg1: i32, %arg2: i32, %arg3: memref<1x2x128xf32, #tpu.memory_space<vmem>>, %arg4: memref<2x128xf32, #tpu.memory_space<vmem>>, %arg5: memref<1x2x128xf32, #tpu.memory_space<vmem>>) attributes {dimension_semantics = [#tpu.dimension_semantics<parallel>, #tpu.dimension_semantics<parallel>, #tpu.dimension_semantics<arbitrary>], iteration_bounds = array<i64: 1, 1, 2>, scalar_prefetch = 0 : i64, scratch_operands = 0 : i64, tpu.core_type = #tpu.core_type<tc>, window_params = [{transform_indices = @transform_0, window_bounds = array<i64: 1, 2, 128>}, {transform_indices = @transform_1, window_bounds = array<i64: 2, 128>}, {transform_indices = @transform_2, window_bounds = array<i64: 1, 2, 128>}]} {
    %c0 = arith.constant 0 : index
    %c0_0 = arith.constant 0 : index
    %c0_1 = arith.constant 0 : index
    %0 = vector.load %arg3[%c0, %c0_0, %c0_1] : memref<1x2x128xf32, #tpu.memory_space<vmem>>, vector<1x2x128xf32>
    %1 = vector.shape_cast %0 : vector<1x2x128xf32> to vector<2x128xf32>
    %c0_2 = arith.constant 0 : index
    %c0_3 = arith.constant 0 : index
    %2 = vector.load %arg4[%c0_2, %c0_3] : memref<2x128xf32, #tpu.memory_space<vmem>>, vector<2x128xf32>
    %3 = arith.addf %1, %2 : vector<2x128xf32>
    %c0_4 = arith.constant 0 : index
    %c0_5 = arith.constant 0 : index
    %c0_6 = arith.constant 0 : index
    %4 = vector.load %arg5[%c0_4, %c0_5, %c0_6] : memref<1x2x128xf32, #tpu.memory_space<vmem>>, vector<1x2x128xf32>
    %5 = vector.shape_cast %4 : vector<1x2x128xf32> to vector<2x128xf32>
    %6 = vector.shape_cast %3 : vector<2x128xf32> to vector<1x2x128xf32>
    tpu.vector_store %arg5[%c0_4, %c0_5, %c0_6], %6 {strides = array<i32>} : memref<1x2x128xf32, #tpu.memory_space<vmem>>, vector<1x2x128xf32>,
    return
  }
  func.func @transform_0(%arg0: i32, %arg1: i32, %arg2: i32) -> (i32, i32, i32) {
    %c0_i32 = arith.constant 0 : i32
    return %arg2, %arg1, %arg0 : i32, i32, i32
  }
  func.func @transform_1(%arg0: i32, %arg1: i32, %arg2: i32) -> (i32, i32) {
    %c0_i32 = arith.constant 0 : i32
    return %arg1, %arg0 : i32, i32
  }
  func.func @transform_2(%arg0: i32, %arg1: i32, %arg2: i32) -> (i32, i32, i32) {
    %c0_i32 = arith.constant 0 : i32
    return %arg2, %arg1, %arg0 : i32, i32, i32
  }
}

</mosaic_0001>

<bundles_post_ra>
// kernel: positional_encoding_sincos.1
= control target key start
LH: loop header
LB: loop body
LE: loop exit
PB: predicated region body
PF: predicated region fallthrough
CT: control target
= control target key end

     0   :  { %s410_s9 = smov 0   ;;  %s387_s10 = smov 0   ;;  %s424_s0 = inlined_call_operand.vmem [shape: f32[2,2,128], index: 0, kind: input, shape index: {}]   ;;  %s425_s1 = inlined_call_operand.vmem [shape: f32[2,128], index: 1, kind: input, shape index: {}]   ;;  %s426_s2 = inlined_call_operand.vmem [shape: f32[2,2,128], index: 2, kind: output, shape index: {}]  }
   0x1   :  { %s391_s11 = smov 0  }
   0x2 LB: > { %s24_s12 = sadd.s32 1, %s389_s10  ;;  %p342_p0 = scmp.ge.s32.totalorder %s393_s11, 1  ;;  %s393_s11 = sphi %s391_s11, %s12_s11   ;;  %s389_s10 = sphi %s387_s10, %s388_s10   ;;  %s385_s9 = sphi %s410_s9, %s427_s9  }
   0x3   : > { %p25_p1 = scmp.ge.s32.totalorder %s24_s12, 2  ;;  %p158_p2 = scmp.lt.s32.totalorder %s393_s11, 3 }
   0x5   : > { %s429_s12 = smov (%p25_p1, %s24_s12), 0  ;;  %p159_p3 = pnand %p342_p0, %p158_p2 }
   0x6   : > { %p197_p4 = scmp.lt.s32.totalorder (!%p159_p3), %s385_s9, 1  ;;  %v225_v0 = vld [vmem:[%s425_s1] sm:$0x3] (!%p159_p3) }
   0x7   : > { %162 = sbr.rel (%p159_p3) target bundleno = 21 (0x15), region = 28 }
   0xe   : > { %s431_s9 = smov (!%p197_p4, %s385_s9), 1 }
   0xf   : > { %s343_s13 = sshll.u32 %s431_s9, 1 }
  0x10   : > { %s206_s18 = scalar_lea.vmem %s424_s0, %s343_s13  ;;  %s223_s21 = scalar_lea.vmem %s426_s2, %s343_s13 }
  0x11   : > { %v224_v1 = vld [vmem:[%s206_s18] sm:$0x3] }
  0x12   : > { %v226_v2 = vadd.f32 %v225_v0, %v224_v1 }
  0x14   : > { %227 = vst [vmem:[%s223_s21] sm:$0x3] %v226_v2 }
  0x15 PF: > { %s12_s11 = sadd.s32 1, %s393_s11   ;;  %s427_s9 = smov %s389_s10 }
  0x16   : > { %p9_p5 = scmp.ge.s32.totalorder %s12_s11, 4   ;;  %s388_s10 = smov %s429_s12  }
  0x18   :  { %11 = sbr.rel (!%p9_p5) target bundleno = 2 (0x2), region = 61 }

</bundles_post_ra>
